<compile_context>
chip_gen: v5e
topology: v5e:2x2
jax: 0.10.0
libtpu: 0.0.40
codegen_flags: <defaults>
</compile_context>

<pallas_src>
import math
import functools

import jax
import jax.numpy as jnp
from jax import lax
from jax.experimental import pallas as pl
from jax.experimental.pallas import tpu as pltpu


def _round_up(x, m):
    return ((x + m - 1) // m) * m


def _acos_approx(x):
    """arccos(x) for x in [-1,1], |err| <= 2e-8 (A&S 4.4.46).

    Only used on the (TILE_N, 1) per-row finalize path, so its VALU cost is
    negligible; the hot (TILE_N, TILE_C) path never calls it.
    """
    xa = jnp.minimum(jnp.abs(x), jnp.float32(1.0))
    p = jnp.float32(-0.0012624911)
    for c in (0.0066700901, -0.0170881256, 0.0308918810, -0.0501743046,
              0.0889789874, -0.2145988016, 1.5707963050):
        p = p * xa + jnp.float32(c)
    r = jnp.sqrt(jnp.float32(1.0) - xa) * p
    return jnp.where(x >= 0, r, jnp.float32(math.pi) - r)


def _sface_kernel(x_ref, w_ref, label_ref,                          # inputs
                  out_ref, wyix_ref, intra_ref, inter_ref, wjsum_ref,  # outputs
                  acc_yi, acc_inter, acc_wjs,                       # VMEM scratch
                  *, s, k, a, b, tile_c):
    j = pl.program_id(1)

    @pl.when(j == 0)
    def _init():
        acc_yi[...] = jnp.zeros_like(acc_yi)
        acc_inter[...] = jnp.zeros_like(acc_inter)
        acc_wjs[...] = jnp.zeros_like(acc_wjs)

    # cosine tile: [TILE_N, D] x [TILE_C, D] -> (TILE_N, TILE_C) f32 on the MXU.
    # k-k contraction keeps the weight in its natural (C, D) layout (no wrapper
    # transpose pass) and the output lane-dense along C.
    cosine = lax.dot_general(x_ref[...], w_ref[...],
                             dimension_numbers=(((1,), (1,)), ((), ())),
                             preferred_element_type=jnp.float32)
    out_ref[...] = cosine * jnp.float32(s)        # lane-dense (TILE_N, TILE_C) store

    # Target mask: local lane iota vs. (label - j*tile_c).  The subtraction is
    # O(TILE_N); the old global-column add was a full-tile int op on the
    # saturated VALU slot.
    lbl_local = label_ref[...] - j * tile_c                      # (TILE_N, 1) i32
    col = lax.broadcasted_iota(jnp.int32, cosine.shape, 1)
    is_target = col == lbl_local

    cz = jnp.where(is_target, jnp.float32(0.0), cosine)          # zero_hot * cosine

    # weight_j = sigmoid(-k*(acos(c)-b)) ~= sigmoid(k*(c - cos b)/sin b).
    # The acos is linearized around the threshold cos(b); away from it the
    # k=80 sigmoid is saturated, so |err| <= ~1.5e-3 (well under the ~4e-3 bf16
    # cosine rounding already present).  Exp argument clamped so it can never
    # overflow; the reciprocal rides the EUP slot.
    k_sin = jnp.float32(k / math.sin(b))
    e_arg = jnp.minimum(k_sin * (jnp.float32(math.cos(b)) - cz), jnp.float32(80.0))
    weight_j = pl.reciprocal(jnp.float32(1.0) + jnp.exp(e_arg), approx=True)

    # Per-row stats in cosine units (scale by s exactly once at finalize).
    # Cross-lane sums ride the XLU slot, exp/reciprocal ride the EUP slot; both
    # have slack next to the VALU-bound elementwise work.
    zsum = jnp.sum(cz, axis=1, keepdims=True)
    acc_yi[...] += jnp.sum(cosine, axis=1, keepdims=True) - zsum   # target cosine
    acc_inter[...] += jnp.sum(weight_j * cz, axis=1, keepdims=True)
    acc_wjs[...] += zsum

    @pl.when(j == pl.num_programs(1) - 1)
    def _finalize():
        cy = acc_yi[...]                                           # cosine_yi
        wyix = cy * jnp.float32(s)
        theta_yi = _acos_approx(cy)
        e_yi = jnp.minimum(-jnp.float32(k) * (theta_yi - jnp.float32(a)),
                           jnp.float32(80.0))
        weight_yi = pl.reciprocal(jnp.float32(1.0) + jnp.exp(e_yi), approx=True)
        wyix_ref[...] = wyix
        intra_ref[...] = -weight_yi * wyix
        inter_ref[...] = acc_inter[...] * jnp.float32(s)
        wjsum_ref[...] = acc_wjs[...]                              # cosine units


def sface_loss_forward(x, weight, label, *, s=64.0, k=80.0, a=0.8, b=1.23,
                       tile_n=256, tile_c=1024, matmul_dtype=jnp.bfloat16):
    """Pallas implementation of SFaceLoss.forward (device_id=None semantics).

    Pass matmul_dtype=jnp.float32 to remove the bf16 MXU-operand quantization
    (at 2x kernel HBM traffic for the operands).
    """
    N, D = x.shape
    C, D2 = weight.shape
    assert D == D2
    x = x.astype(jnp.float32)
    weight = weight.astype(jnp.float32)

    # ---- tile selection: pad N / C up to tile multiples instead of collapsing
    # to one giant tile (the old fallback exceeded VMEM for real class counts).
    tile_n = min(int(tile_n), _round_up(N, 16))
    tile_n = max(16, (tile_n // 16) * 16)
    n_pad = _round_up(N, tile_n)
    # v7x megacore: keep >= 2 programs on the parallel i axis when batch allows.
    if n_pad // tile_n < 2 and N >= 32:
        tile_n = max(16, (n_pad // 2 // 16) * 16)
        n_pad = _round_up(N, tile_n)

    tile_c = min(int(tile_c), _round_up(C, 128))
    tile_c = max(128, (tile_c // 128) * 128)
    c_pad = _round_up(C, tile_c)

    # ---- one-time row normalization, fused with the operand cast (no separate
    # transpose pass over the (C, D) class matrix). ----
    xn = (x * lax.rsqrt(jnp.maximum(jnp.sum(x * x, axis=1, keepdims=True),
                                    jnp.float32(1e-24)))).astype(matmul_dtype)
    wn = (weight * lax.rsqrt(jnp.maximum(jnp.sum(weight * weight, axis=1,
                                                 keepdims=True),
                                         jnp.float32(1e-24)))).astype(matmul_dtype)
    label2 = label.reshape(N, 1).astype(jnp.int32)
    if n_pad != N:
        xn = jnp.pad(xn, ((0, n_pad - N), (0, 0)))          # zero rows -> cosine 0
        label2 = jnp.pad(label2, ((0, n_pad - N), (0, 0)))
    if c_pad != C:
        wn = jnp.pad(wn, ((0, c_pad - C), (0, 0)))           # zero class rows ->
                                                             # 0 contribution to sums

    grid = (n_pad // tile_n, c_pad // tile_c)
    kernel = functools.partial(_sface_kernel, s=float(s), k=float(k),
                               a=float(a), b=float(b), tile_c=tile_c)

    # VMEM budget from the actual double-buffered tile footprint (+ slack),
    # capped at v7x's 64 MiB per-core VMEM.
    esz = jnp.dtype(matmul_dtype).itemsize
    vmem_est = (2 * tile_n * D * esz           # x tile, double-buffered
                + 2 * tile_c * D * esz         # weight tile, double-buffered
                + 2 * tile_n * tile_c * 4      # output tile, double-buffered
                + 13 * tile_n * 128 * 4)       # label + small outs + scratch
    vmem_limit = int(min(max(vmem_est + (8 << 20), 24 << 20), 64 << 20))

    output, wyix, intra, inter, wjsum = pl.pallas_call(
        kernel,
        grid_spec=pltpu.PrefetchScalarGridSpec(
            num_scalar_prefetch=0,
            grid=grid,
            in_specs=[
                pl.BlockSpec((tile_n, D), lambda i, j: (i, 0)),       # x tile
                pl.BlockSpec((tile_c, D), lambda i, j: (j, 0)),       # weight tile
                pl.BlockSpec((tile_n, 1), lambda i, j: (i, 0)),       # labels
            ],
            out_specs=(
                pl.BlockSpec((tile_n, tile_c), lambda i, j: (i, j)),  # s * cosine
                pl.BlockSpec((tile_n, 1), lambda i, j: (i, 0)),       # WyiX
                pl.BlockSpec((tile_n, 1), lambda i, j: (i, 0)),       # intra
                pl.BlockSpec((tile_n, 1), lambda i, j: (i, 0)),       # inter
                pl.BlockSpec((tile_n, 1), lambda i, j: (i, 0)),       # sum_j Wj/s
            ),
            scratch_shapes=[
                pltpu.VMEM((tile_n, 1), jnp.float32),   # acc cosine_yi
                pltpu.VMEM((tile_n, 1), jnp.float32),   # acc inter (cosine units)
                pltpu.VMEM((tile_n, 1), jnp.float32),   # acc sum(zero_hot*cosine)
            ],
        ),
        out_shape=(
            jax.ShapeDtypeStruct((n_pad, c_pad), jnp.float32),
            jax.ShapeDtypeStruct((n_pad, 1), jnp.float32),
            jax.ShapeDtypeStruct((n_pad, 1), jnp.float32),
            jax.ShapeDtypeStruct((n_pad, 1), jnp.float32),
            jax.ShapeDtypeStruct((n_pad, 1), jnp.float32),
        ),
        compiler_params=pltpu.CompilerParams(
            dimension_semantics=("parallel", "arbitrary"),
            vmem_limit_bytes=vmem_limit,
        ),
    )(xn, wn, label2)

    if n_pad != N or c_pad != C:
        output = output[:N, :C]
    wyix = wyix[:N, 0]
    intra = intra[:N, 0]
    inter = inter[:N, 0]
    wjsum = wjsum[:N, 0]

    # Tiny O(N) glue reductions; the hot (N, C) path is entirely in-kernel.
    intra_mean = jnp.mean(intra)
    inter_mean = jnp.mean(inter)
    loss = intra_mean + inter_mean
    wyi_s_mean = jnp.mean(wyix) / s
    wj_s_mean = jnp.sum(wjsum) / (N * C)
    return output, loss, intra_mean, inter_mean, wyi_s_mean, wj_s_mean


def sface_loss_reference(x, weight, label, *, s=64.0, k=80.0, a=0.8, b=1.23,
                         matmul_dtype=jnp.float32):
    """Pure-JAX reference mirroring the PyTorch module (exact acos / sigmoid).

    With matmul_dtype=bfloat16 it applies the same MXU operand quantization as
    the kernel; everything downstream stays f32.
    """
    xn = x * lax.rsqrt(jnp.maximum(jnp.sum(x * x, axis=1, keepdims=True), 1e-24))
    wn = weight * lax.rsqrt(jnp.maximum(jnp.sum(weight * weight, axis=1, keepdims=True), 1e-24))
    cosine = jnp.dot(xn.astype(matmul_dtype), wn.astype(matmul_dtype).T,
                     preferred_element_type=jnp.float32)
    output = cosine * s
    one_hot = jax.nn.one_hot(label, weight.shape[0], dtype=jnp.float32)
    zero_hot = 1.0 - one_hot
    wyix = jnp.sum(one_hot * output, axis=1)
    theta_yi = jnp.arccos(jnp.clip(wyix / s, -1.0, 1.0))
    weight_yi = 1.0 / (1.0 + jnp.exp(-k * (theta_yi - a)))
    intra = -weight_yi * wyix
    wj = zero_hot * output
    theta_j = jnp.arccos(jnp.clip(wj / s, -1.0, 1.0))
    weight_j = 1.0 / (1.0 + jnp.exp(k * (theta_j - b)))
    inter = jnp.sum(weight_j * wj, axis=1)
    loss = intra.mean() + inter.mean()
    return output, loss, intra.mean(), inter.mean(), (wyix / s).mean(), (wj / s).mean()


def xavier_normal_out(key, out_features, in_features, gain=2.0):
    # mode='out' -> fan = fan_out = out_features ; std = gain * sqrt(2 / fan)
    std = gain * math.sqrt(2.0 / float(out_features))
    return std * jax.random.normal(key, (out_features, in_features), jnp.float32)


if __name__ == "__main__":
    names = ("output", "loss", "intra", "inter", "Wyi_s", "Wj_s")
    tols = [dict(rtol=1e-3, atol=1e-2),   # output (values up to s=64)
            dict(rtol=3e-2, atol=3e-2),   # loss
            dict(rtol=3e-2, atol=3e-2),   # intra mean
            dict(rtol=3e-2, atol=3e-2),   # inter mean
            dict(rtol=2e-2, atol=1e-3),   # Wyi_s mean
            dict(rtol=2e-2, atol=1e-3)]   # Wj_s mean

    def run_case(case_key, N, D, C, tile_n, tile_c):
        kx, kw, kl = jax.random.split(case_key, 3)
        x = jax.random.normal(kx, (N, D), jnp.float32)
        weight = xavier_normal_out(kw, C, D, gain=2.0)
        label = jax.random.randint(kl, (N,), 0, C, jnp.int32)

        outs = sface_loss_forward(x, weight, label, tile_n=tile_n, tile_c=tile_c)
        outs = jax.block_until_ready(outs)
        assert outs[0].shape == (N, C)

        # 1) Kernel logic (tiling, padding, accumulation, target mask, weight_j
        #    approximation) vs. a reference with identical bf16 MXU quantization.
        refs_q = sface_loss_reference(x, weight, label, matmul_dtype=jnp.bfloat16)
        for name, got, ref, tol in zip(names, outs, refs_q, tols):
            assert jnp.allclose(got, ref, **tol), (name, got, ref)

        # 2) Scaled cosine vs. exact f32 reference; bf16 operand rounding bounds
        #    |delta| by ~s * 2^-8 for unit rows.
        refs_f32 = sface_loss_reference(x, weight, label, matmul_dtype=jnp.float32)
        assert jnp.allclose(outs[0], refs_f32[0], rtol=1e-2, atol=0.35)

    key = jax.random.PRNGKey(0)
    k1, k2 = jax.random.split(key)
    # Exact tiling: 2x2 grid, no padding.
    run_case(k1, N=32, D=128, C=256, tile_n=16, tile_c=128)
    # Ragged shapes: exercises the N/C zero-padding path (N=30->32, C=200->256).
    run_case(k2, N=30, D=128, C=200, tile_n=16, tile_c=128)

    print("KERNEL_OK")
</pallas_src>

<mosaic_0001>
module attributes {stable_mosaic.version = 11 : i64} {
  func.func @_sface_kernel(%arg0: i32, %arg1: i32, %arg2: memref<16x128xbf16, #tpu.memory_space<vmem>>, %arg3: memref<128x128xbf16, #tpu.memory_space<vmem>>, %arg4: memref<16x1xi32, #tpu.memory_space<vmem>>, %arg5: memref<16x128xf32, #tpu.memory_space<vmem>>, %arg6: memref<16x1xf32, #tpu.memory_space<vmem>>, %arg7: memref<16x1xf32, #tpu.memory_space<vmem>>, %arg8: memref<16x1xf32, #tpu.memory_space<vmem>>, %arg9: memref<16x1xf32, #tpu.memory_space<vmem>>, %arg10: memref<16x1xf32, #tpu.memory_space<vmem>>, %arg11: memref<16x1xf32, #tpu.memory_space<vmem>>, %arg12: memref<16x1xf32, #tpu.memory_space<vmem>>) attributes {dimension_semantics = [#tpu.dimension_semantics<parallel>, #tpu.dimension_semantics<arbitrary>], iteration_bounds = array<i64: 2, 2>, scalar_prefetch = 0 : i64, scratch_operands = 3 : i64, tpu.core_type = #tpu.core_type<tc>, window_params = [{transform_indices = @transform_0, window_bounds = array<i64: 16, 128>}, {transform_indices = @transform_1, window_bounds = array<i64: 128, 128>}, {transform_indices = @transform_2, window_bounds = array<i64: 16, 1>}, {transform_indices = @transform_3, window_bounds = array<i64: 16, 128>}, {transform_indices = @transform_4, window_bounds = array<i64: 16, 1>}, {transform_indices = @transform_5, window_bounds = array<i64: 16, 1>}, {transform_indices = @transform_6, window_bounds = array<i64: 16, 1>}, {transform_indices = @transform_7, window_bounds = array<i64: 16, 1>}]} {
    %c0_i32 = arith.constant 0 : i32
    %0 = arith.cmpi eq, %arg1, %c0_i32 : i32
    %1 = arith.extui %0 : i1 to i32
    %c0_i32_0 = arith.constant 0 : i32
    %2 = arith.cmpi ne, %1, %c0_i32_0 : i32
    scf.if %2 {
      %cst_30 = arith.constant 0.000000e+00 : f32
      %48 = vector.broadcast %cst_30 : f32 to vector<16x1xf32>
      %c0_31 = arith.constant 0 : index
      %c0_32 = arith.constant 0 : index
      %49 = vector.load %arg10[%c0_31, %c0_32] : memref<16x1xf32, #tpu.memory_space<vmem>>, vector<16x1xf32>
      tpu.vector_store %arg10[%c0_31, %c0_32], %48 {strides = array<i32>} : memref<16x1xf32, #tpu.memory_space<vmem>>, vector<16x1xf32>,
      %cst_33 = arith.constant 0.000000e+00 : f32
      %50 = vector.broadcast %cst_33 : f32 to vector<16x1xf32>
      %c0_34 = arith.constant 0 : index
      %c0_35 = arith.constant 0 : index
      %51 = vector.load %arg11[%c0_34, %c0_35] : memref<16x1xf32, #tpu.memory_space<vmem>>, vector<16x1xf32>
      tpu.vector_store %arg11[%c0_34, %c0_35], %50 {strides = array<i32>} : memref<16x1xf32, #tpu.memory_space<vmem>>, vector<16x1xf32>,
      %cst_36 = arith.constant 0.000000e+00 : f32
      %52 = vector.broadcast %cst_36 : f32 to vector<16x1xf32>
      %c0_37 = arith.constant 0 : index
      %c0_38 = arith.constant 0 : index
      %53 = vector.load %arg12[%c0_37, %c0_38] : memref<16x1xf32, #tpu.memory_space<vmem>>, vector<16x1xf32>
      tpu.vector_store %arg12[%c0_37, %c0_38], %52 {strides = array<i32>} : memref<16x1xf32, #tpu.memory_space<vmem>>, vector<16x1xf32>,
    } else {
    }
    %c0 = arith.constant 0 : index
    %c0_1 = arith.constant 0 : index
    %3 = vector.load %arg2[%c0, %c0_1] : memref<16x128xbf16, #tpu.memory_space<vmem>>, vector<16x128xbf16>
    %c0_2 = arith.constant 0 : index
    %c0_3 = arith.constant 0 : index
    %4 = vector.load %arg3[%c0_2, %c0_3] : memref<128x128xbf16, #tpu.memory_space<vmem>>, vector<128x128xbf16>
    %cst = arith.constant dense<0.000000e+00> : vector<16x128xf32>
    %5 = tpu.matmul %3, %4, %cst {dimension_numbers = #tpu.dot_dimension_numbers<[1], [1], [0], [0], [0, 0, 1, 0], [], []>} : vector<16x128xbf16>, vector<128x128xbf16>, vector<16x128xf32> -> vector<16x128xf32>
    %cst_4 = arith.constant 6.400000e+01 : f32
    %6 = vector.broadcast %cst_4 : f32 to vector<16x128xf32>
    %7 = arith.mulf %5, %6 : vector<16x128xf32>
    %c0_5 = arith.constant 0 : index
    %c0_6 = arith.constant 0 : index
    %8 = vector.load %arg5[%c0_5, %c0_6] : memref<16x128xf32, #tpu.memory_space<vmem>>, vector<16x128xf32>
    tpu.vector_store %arg5[%c0_5, %c0_6], %7 {strides = array<i32>} : memref<16x128xf32, #tpu.memory_space<vmem>>, vector<16x128xf32>,
    %c0_7 = arith.constant 0 : index
    %c0_8 = arith.constant 0 : index
    %9 = vector.load %arg4[%c0_7, %c0_8] : memref<16x1xi32, #tpu.memory_space<vmem>>, vector<16x1xi32>
    %c128_i32 = arith.constant 128 : i32
    %10 = arith.muli %arg1, %c128_i32 : i32
    %11 = vector.broadcast %10 : i32 to vector<16x1xi32>
    %12 = arith.subi %9, %11 : vector<16x1xi32>
    %13 = tpu.iota {dimensions = array<i32: 1>} : vector<16x128xi32>
    %14 = vector.broadcast %12 : vector<16x1xi32> to vector<16x128xi32>
    %15 = arith.cmpi eq, %13, %14 : vector<16x128xi32>
    %cst_9 = arith.constant 0.000000e+00 : f32
    %16 = vector.broadcast %cst_9 : f32 to vector<16x128xf32>
    %17 = arith.select %15, %16, %5 : vector<16x128xi1>, vector<16x128xf32>
    %cst_10 = arith.constant 0.334237725 : f32
    %18 = vector.broadcast %cst_10 : f32 to vector<16x128xf32>
    %19 = arith.subf %18, %17 : vector<16x128xf32>
    %cst_11 = arith.constant 84.8816452 : f32
    %20 = vector.broadcast %cst_11 : f32 to vector<16x128xf32>
    %21 = arith.mulf %20, %19 : vector<16x128xf32>
    %cst_12 = arith.constant 8.000000e+01 : f32
    %22 = vector.broadcast %cst_12 : f32 to vector<16x128xf32>
    %23 = arith.minimumf %21, %22 : vector<16x128xf32>
    %24 = math.exp %23 : vector<16x128xf32>
    %cst_13 = arith.constant 1.000000e+00 : f32
    %25 = vector.broadcast %cst_13 : f32 to vector<16x128xf32>
    %26 = arith.addf %25, %24 : vector<16x128xf32>
    %27 = tpu.reciprocal %26 {approx = true} : vector<16x128xf32> -> vector<16x128xf32>
    %cst_14 = arith.constant dense<0.000000e+00> : vector<16xf32>
    %28 = vector.multi_reduction <add>, %17, %cst_14 [1] : vector<16x128xf32> to vector<16xf32>
    %29 = vector.shape_cast %28 : vector<16xf32> to vector<16x1xf32>
    %c0_15 = arith.constant 0 : index
    %c0_16 = arith.constant 0 : index
    %30 = vector.load %arg10[%c0_15, %c0_16] : memref<16x1xf32, #tpu.memory_space<vmem>>, vector<16x1xf32>
    %cst_17 = arith.constant dense<0.000000e+00> : vector<16xf32>
    %31 = vector.multi_reduction <add>, %5, %cst_17 [1] : vector<16x128xf32> to vector<16xf32>
    %32 = vector.shape_cast %31 : vector<16xf32> to vector<16x1xf32>
    %33 = arith.subf %32, %29 : vector<16x1xf32>
    %34 = arith.addf %30, %33 : vector<16x1xf32>
    %c0_18 = arith.constant 0 : index
    %c0_19 = arith.constant 0 : index
    %35 = vector.load %arg10[%c0_18, %c0_19] : memref<16x1xf32, #tpu.memory_space<vmem>>, vector<16x1xf32>
    tpu.vector_store %arg10[%c0_18, %c0_19], %34 {strides = array<i32>} : memref<16x1xf32, #tpu.memory_space<vmem>>, vector<16x1xf32>,
    %c0_20 = arith.constant 0 : index
    %c0_21 = arith.constant 0 : index
    %36 = vector.load %arg11[%c0_20, %c0_21] : memref<16x1xf32, #tpu.memory_space<vmem>>, vector<16x1xf32>
    %37 = arith.mulf %27, %17 : vector<16x128xf32>
    %cst_22 = arith.constant dense<0.000000e+00> : vector<16xf32>
    %38 = vector.multi_reduction <add>, %37, %cst_22 [1] : vector<16x128xf32> to vector<16xf32>
    %39 = vector.shape_cast %38 : vector<16xf32> to vector<16x1xf32>
    %40 = arith.addf %36, %39 : vector<16x1xf32>
    %c0_23 = arith.constant 0 : index
    %c0_24 = arith.constant 0 : index
    %41 = vector.load %arg11[%c0_23, %c0_24] : memref<16x1xf32, #tpu.memory_space<vmem>>, vector<16x1xf32>
    tpu.vector_store %arg11[%c0_23, %c0_24], %40 {strides = array<i32>} : memref<16x1xf32, #tpu.memory_space<vmem>>, vector<16x1xf32>,
    %c0_25 = arith.constant 0 : index
    %c0_26 = arith.constant 0 : index
    %42 = vector.load %arg12[%c0_25, %c0_26] : memref<16x1xf32, #tpu.memory_space<vmem>>, vector<16x1xf32>
    %43 = arith.addf %42, %29 : vector<16x1xf32>
    %c0_27 = arith.constant 0 : index
    %c0_28 = arith.constant 0 : index
    %44 = vector.load %arg12[%c0_27, %c0_28] : memref<16x1xf32, #tpu.memory_space<vmem>>, vector<16x1xf32>
    tpu.vector_store %arg12[%c0_27, %c0_28], %43 {strides = array<i32>} : memref<16x1xf32, #tpu.memory_space<vmem>>, vector<16x1xf32>,
    %c1_i32 = arith.constant 1 : i32
    %45 = arith.cmpi eq, %arg1, %c1_i32 : i32
    %46 = arith.extui %45 : i1 to i32
    %c0_i32_29 = arith.constant 0 : i32
    %47 = arith.cmpi ne, %46, %c0_i32_29 : i32
    scf.if %47 {
      %c0_30 = arith.constant 0 : index
      %c0_31 = arith.constant 0 : index
      %48 = vector.load %arg10[%c0_30, %c0_31] : memref<16x1xf32, #tpu.memory_space<vmem>>, vector<16x1xf32>
      %cst_32 = arith.constant 6.400000e+01 : f32
      %49 = vector.broadcast %cst_32 : f32 to vector<16x1xf32>
      %50 = arith.mulf %48, %49 : vector<16x1xf32>
      %51 = math.absf %48 : vector<16x1xf32>
      %cst_33 = arith.constant 1.000000e+00 : f32
      %52 = vector.broadcast %cst_33 : f32 to vector<16x1xf32>
      %53 = arith.minimumf %51, %52 : vector<16x1xf32>
      %cst_34 = arith.constant -0.0012624911 : f32
      %54 = vector.broadcast %cst_34 : f32 to vector<16x1xf32>
      %55 = arith.mulf %54, %53 : vector<16x1xf32>
      %cst_35 = arith.constant 6.670090e-03 : f32
      %56 = vector.broadcast %cst_35 : f32 to vector<16x1xf32>
      %57 = arith.addf %55, %56 : vector<16x1xf32>
      %58 = arith.mulf %57, %53 : vector<16x1xf32>
      %cst_36 = arith.constant -0.0170881264 : f32
      %59 = vector.broadcast %cst_36 : f32 to vector<16x1xf32>
      %60 = arith.addf %58, %59 : vector<16x1xf32>
      %61 = arith.mulf %60, %53 : vector<16x1xf32>
      %cst_37 = arith.constant 0.0308918804 : f32
      %62 = vector.broadcast %cst_37 : f32 to vector<16x1xf32>
      %63 = arith.addf %61, %62 : vector<16x1xf32>
      %64 = arith.mulf %63, %53 : vector<16x1xf32>
      %cst_38 = arith.constant -0.0501743034 : f32
      %65 = vector.broadcast %cst_38 : f32 to vector<16x1xf32>
      %66 = arith.addf %64, %65 : vector<16x1xf32>
      %67 = arith.mulf %66, %53 : vector<16x1xf32>
      %cst_39 = arith.constant 0.0889789909 : f32
      %68 = vector.broadcast %cst_39 : f32 to vector<16x1xf32>
      %69 = arith.addf %67, %68 : vector<16x1xf32>
      %70 = arith.mulf %69, %53 : vector<16x1xf32>
      %cst_40 = arith.constant -0.214598805 : f32
      %71 = vector.broadcast %cst_40 : f32 to vector<16x1xf32>
      %72 = arith.addf %70, %71 : vector<16x1xf32>
      %73 = arith.mulf %72, %53 : vector<16x1xf32>
      %cst_41 = arith.constant 1.57079625 : f32
      %74 = vector.broadcast %cst_41 : f32 to vector<16x1xf32>
      %75 = arith.addf %73, %74 : vector<16x1xf32>
      %cst_42 = arith.constant 1.000000e+00 : f32
      %76 = vector.broadcast %cst_42 : f32 to vector<16x1xf32>
      %77 = arith.subf %76, %53 : vector<16x1xf32>
      %78 = math.sqrt %77 : vector<16x1xf32>
      %79 = arith.mulf %78, %75 : vector<16x1xf32>
      %cst_43 = arith.constant 0.000000e+00 : f32
      %80 = vector.broadcast %cst_43 : f32 to vector<16x1xf32>
      %81 = arith.cmpf oge, %48, %80 : vector<16x1xf32>
      %cst_44 = arith.constant 3.14159274 : f32
      %82 = vector.broadcast %cst_44 : f32 to vector<16x1xf32>
      %83 = arith.subf %82, %79 : vector<16x1xf32>
      %84 = arith.select %81, %79, %83 : vector<16x1xi1>, vector<16x1xf32>
      %cst_45 = arith.constant 0.000000e+00 : f32
      %cst_46 = arith.constant 8.000000e+01 : f32
      %85 = arith.subf %cst_45, %cst_46 : f32
      %cst_47 = arith.constant 8.000000e-01 : f32
      %86 = vector.broadcast %cst_47 : f32 to vector<16x1xf32>
      %87 = arith.subf %84, %86 : vector<16x1xf32>
      %88 = vector.broadcast %85 : f32 to vector<16x1xf32>
      %89 = arith.mulf %88, %87 : vector<16x1xf32>
      %cst_48 = arith.constant 8.000000e+01 : f32
      %90 = vector.broadcast %cst_48 : f32 to vector<16x1xf32>
      %91 = arith.minimumf %89, %90 : vector<16x1xf32>
      %92 = math.exp %91 : vector<16x1xf32>
      %cst_49 = arith.constant 1.000000e+00 : f32
      %93 = vector.broadcast %cst_49 : f32 to vector<16x1xf32>
      %94 = arith.addf %93, %92 : vector<16x1xf32>
      %95 = tpu.reciprocal %94 {approx = true} : vector<16x1xf32> -> vector<16x1xf32>
      %c0_50 = arith.constant 0 : index
      %c0_51 = arith.constant 0 : index
      %96 = vector.load %arg6[%c0_50, %c0_51] : memref<16x1xf32, #tpu.memory_space<vmem>>, vector<16x1xf32>
      tpu.vector_store %arg6[%c0_50, %c0_51], %50 {strides = array<i32>} : memref<16x1xf32, #tpu.memory_space<vmem>>, vector<16x1xf32>,
      %cst_52 = arith.constant 0.000000e+00 : f32
      %97 = vector.broadcast %cst_52 : f32 to vector<16x1xf32>
      %98 = arith.subf %97, %95 : vector<16x1xf32>
      %99 = arith.mulf %98, %50 : vector<16x1xf32>
      %c0_53 = arith.constant 0 : index
      %c0_54 = arith.constant 0 : index
      %100 = vector.load %arg7[%c0_53, %c0_54] : memref<16x1xf32, #tpu.memory_space<vmem>>, vector<16x1xf32>
      tpu.vector_store %arg7[%c0_53, %c0_54], %99 {strides = array<i32>} : memref<16x1xf32, #tpu.memory_space<vmem>>, vector<16x1xf32>,
      %c0_55 = arith.constant 0 : index
      %c0_56 = arith.constant 0 : index
      %101 = vector.load %arg11[%c0_55, %c0_56] : memref<16x1xf32, #tpu.memory_space<vmem>>, vector<16x1xf32>
      %cst_57 = arith.constant 6.400000e+01 : f32
      %102 = vector.broadcast %cst_57 : f32 to vector<16x1xf32>
      %103 = arith.mulf %101, %102 : vector<16x1xf32>
      %c0_58 = arith.constant 0 : index
      %c0_59 = arith.constant 0 : index
      %104 = vector.load %arg8[%c0_58, %c0_59] : memref<16x1xf32, #tpu.memory_space<vmem>>, vector<16x1xf32>
      tpu.vector_store %arg8[%c0_58, %c0_59], %103 {strides = array<i32>} : memref<16x1xf32, #tpu.memory_space<vmem>>, vector<16x1xf32>,
      %c0_60 = arith.constant 0 : index
      %c0_61 = arith.constant 0 : index
      %105 = vector.load %arg12[%c0_60, %c0_61] : memref<16x1xf32, #tpu.memory_space<vmem>>, vector<16x1xf32>
      %c0_62 = arith.constant 0 : index
      %c0_63 = arith.constant 0 : index
      %106 = vector.load %arg9[%c0_62, %c0_63] : memref<16x1xf32, #tpu.memory_space<vmem>>, vector<16x1xf32>
      tpu.vector_store %arg9[%c0_62, %c0_63], %105 {strides = array<i32>} : memref<16x1xf32, #tpu.memory_space<vmem>>, vector<16x1xf32>,
    } else {
    }
    return
  }
  func.func @transform_0(%arg0: i32, %arg1: i32) -> (i32, i32) {
    %c0_i32 = arith.constant 0 : i32
    %c0_i32_0 = arith.constant 0 : i32
    return %arg0, %c0_i32 : i32, i32
  }
  func.func @transform_1(%arg0: i32, %arg1: i32) -> (i32, i32) {
    %c0_i32 = arith.constant 0 : i32
    %c0_i32_0 = arith.constant 0 : i32
    return %arg1, %c0_i32 : i32, i32
  }
  func.func @transform_2(%arg0: i32, %arg1: i32) -> (i32, i32) {
    %c0_i32 = arith.constant 0 : i32
    %c0_i32_0 = arith.constant 0 : i32
    return %arg0, %c0_i32 : i32, i32
  }
  func.func @transform_3(%arg0: i32, %arg1: i32) -> (i32, i32) {
    %c0_i32 = arith.constant 0 : i32
    return %arg0, %arg1 : i32, i32
  }
  func.func @transform_4(%arg0: i32, %arg1: i32) -> (i32, i32) {
    %c0_i32 = arith.constant 0 : i32
    %c0_i32_0 = arith.constant 0 : i32
    return %arg0, %c0_i32 : i32, i32
  }
  func.func @transform_5(%arg0: i32, %arg1: i32) -> (i32, i32) {
    %c0_i32 = arith.constant 0 : i32
    %c0_i32_0 = arith.constant 0 : i32
    return %arg0, %c0_i32 : i32, i32
  }
  func.func @transform_6(%arg0: i32, %arg1: i32) -> (i32, i32) {
    %c0_i32 = arith.constant 0 : i32
    %c0_i32_0 = arith.constant 0 : i32
    return %arg0, %c0_i32 : i32, i32
  }
  func.func @transform_7(%arg0: i32, %arg1: i32) -> (i32, i32) {
    %c0_i32 = arith.constant 0 : i32
    %c0_i32_0 = arith.constant 0 : i32
    return %arg0, %c0_i32 : i32, i32
  }
}

</mosaic_0001>

<bundles_post_ra>
// kernel: tpu_custom_call.1
= control target key start
LH: loop header
LB: loop body
LE: loop exit
PB: predicated region body
PF: predicated region fallthrough
CT: control target
= control target key end

     0   :  { %s1619_s0 = inlined_call_operand.vmem [shape: bf16[32,128], index: 0, kind: input, shape index: {}]   ;;  %s1620_s1 = inlined_call_operand.hbm [shape: bf16[256,128], index: 1, kind: input, shape index: {}]   ;;  %s1621_s2 = inlined_call_operand.vmem [shape: s32[32,1], index: 2, kind: input, shape index: {}]   ;;  %s1622_s3 = inlined_call_operand.hbm [shape: f32[32,256], index: 3, kind: output, shape index: {0}]   ;;  %s1623_s4 = inlined_call_operand.vmem [shape: f32[32,1], index: 4, kind: output, shape index: {1}]   ;;  %s1624_s5 = inlined_call_operand.vmem [shape: f32[32,1], index: 5, kind: output, shape index: {2}]   ;;  %s1625_s6 = inlined_call_operand.vmem [shape: f32[32,1], index: 6, kind: output, shape index: {3}]   ;;  %s1626_s7 = inlined_call_operand.vmem [shape: f32[32,1], index: 7, kind: output, shape index: {4}]  }
   0x1   :  { %1636 = sst [smem:[#allocation21_spill]] %s1620_s1 }
   0x2   :  { %13 = vsyncpa [#allocation6], 0 }
   0x3   :  { %15 = vsyncpa [#allocation6 + $0x1], 0 }
   0x4   :  { %16 = vsyncpa [#allocation7], 0 }
   0x5   :  { %18 = vsyncpa [#allocation7 + $0x1], 0  ;;  %s1361_s24 = smov 0   ;;  %s1363_s25 = smov 0  }
   0x6   :  { %s1365_s26 = smov 0   ;;  %s1367_s27 = smov 0  }
   0x7   :  { %s1369_s28 = smov 0   ;;  %s1371_s29 = smov 0  }
   0x8   :  { %s1373_s30 = smov 0   ;;  %s1375_s8 = smov 0  }
   0x9   :  { %s1377_s9 = smov 0   ;;  %s1379_s10 = smov 0  }
   0xa   :  { %s1381_s11 = smov 0  }
   0xb LB: > { %1637 = sst [smem:[#allocation11_spill]] %s1272_s24  ;;  %s950_s12 = sadd.s32 4294967295, %s1312_s11   ;;  %s1312_s11 = sphi %s1381_s11, %s24_s11   ;;  %s1308_s10 = sphi %s1379_s10, %s1662_s10   ;;  %s1304_s9 = sphi %s1377_s9, %s1661_s9   ;;  %s1300_s8 = sphi %s1375_s8, %s1660_s8   ;;  %s1296_s30 = sphi %s1373_s30, %s1659_s30   ;;  %s1292_s29 = sphi %s1371_s29, %s1658_s29   ;;  %s1288_s28 = sphi %s1369_s28, %s1657_s28   ;;  %s1284_s27 = sphi %s1367_s27, %s1656_s27   ;;  %s1280_s26 = sphi %s1365_s26, %s1655_s26   ;;  %s1276_s25 = sphi %s1363_s25, %s1664_s25   ;;  %s1272_s24 = sphi %s1361_s24, %s1663_s24  }
   0xc   : > { %1638 = sst [smem:[#allocation12_spill]] %s1280_s26  ;;  %s951_s13 = sadd.s32 4294967294, %s1312_s11  }
   0xd   : > { %1639 = sst [smem:[#allocation13_spill]] %s1288_s28  ;;  %s33_s14 = sadd.s32 1, %s1304_s9 }
   0xe   : > { %1640 = sst [smem:[#allocation14_spill]] %s1292_s29  ;;  %s36_s15 = sadd.s32 1, %s1308_s10 }
   0xf   : > { %1641 = sst [smem:[#allocation15_spill]] %s1304_s9  ;;  %p34_p0 = scmp.ge.s32.totalorder %s33_s14, 2 }
  0x10   : > { %1642 = sst [smem:[#allocation16_spill]] %s1308_s10  ;;  %s69_s16 = sadd.s32 1, %s1292_s29 }
  0x11   : > { %p76_p1 = scmp.ne.s32.totalorder %s1292_s29, %s1288_s28  ;;  %p77_p2 = scmp.eq.s32.totalorder %s1312_s11, 0 }
  0x12   : > { %s1666_s14 = smov (%p34_p0, %s33_s14), 0  ;;  %s1668_s15 = smov (!%p34_p0, %s36_s15), %s1308_s10 }
  0x13   : > { %1643 = sst [smem:[#allocation17_spill]] %s1666_s14  ;;  %s66_s17 = ssub.s32 %s1304_s9, %s1666_s14 }
  0x14   : > { %p1427_p3 = por %p77_p2, %p76_p1  ;;  %p38_p4 = scmp.ge.s32.totalorder %s1668_s15, 2 }
  0x15   : > { %p67_p5 = scmp.eq.s32.totalorder %s66_s17, 0  ;;  %p82_p6 = scmp.ne.s32.totalorder %s1288_s28, %s1284_s27 }
  0x16   : > { %p83_p7 = scmp.eq.s32.totalorder %s950_s12, 0  ;;  %s1670_s15 = smov (%p38_p4, %s1668_s15), 0 }
  0x17   : > { %1645 = sst [smem:[#allocation18_spill]] %s1670_s15  ;;  %s118_s21 = ssub.s32 %s1308_s10, %s1670_s15 }
  0x18   : > { %s1435_s19 = scalar_select %p67_p5, %s1292_s29, %s69_s16  }
  0x19   : > { %p1437_p8 = por %p83_p7, %p82_p6  ;;  %s120_s22 = sor.u32 %s118_s21, %s66_s17 }
  0x1a   : > { %1646 = sst [smem:[#allocation19_spill]] %s1435_s19  ;;  %s123_s23 = sadd.s32 1, %s1280_s26 }
  0x1b   : > { %p121_p9 = scmp.eq.s32.totalorder %s120_s22, 0  ;;  %p133_p10 = scmp.ne.s32.totalorder %s1280_s26, %s1276_s25 }
  0x1c   : > { %p134_p11 = scmp.eq.s32.totalorder %s950_s12, 3  ;;  %p139_p12 = scmp.ne.s32.totalorder %s1276_s25, %s1272_s24 }
  0x1d   : > { %s1449_s27 = scalar_select %p121_p9, %s1280_s26, %s123_s23  }
  0x1e   : > { %p1451_p13 = por %p134_p11, %p133_p10  ;;  %p140_p0 = scmp.eq.s32.totalorder %s951_s13, 3 }
  0x1f   : > { %1648 = sst [smem:[#allocation20_spill]] %s1449_s27  ;;  %p1042_p1 = scmp.lt.s32.totalorder %s1312_s11, 4 }
  0x20   : > { %p1456_p2 = por %p140_p0, %p139_p12  ;;  %s273_s17 = sand.u32 1, %s1292_s29  }
  0x21   : > { %s954_s21 = sshll.u32 %s273_s17, 6  ;;  %s1019_s22 = sshll.u32 %s1304_s9, 6 }
  0x22   : > { %s1651_s1 = sld [smem:[#allocation21_spill]]  ;;  %s277_s23 = scalar_lea.vmem [#allocation5], %s954_s21 }
  0x23   : > { %s285_s19 = sshll.u32 %s277_s23, 4  ;;  %p1035_p4 = pnand %p1042_p1, %p1427_p3  ;;  %s286_s19 = int_to_ptr.vmem [resolvable:$true] %s285_s19 }
  0x24   : > { %p957_p5 = scmp.ge.s32.totalorder %s1312_s11, 1  ;;  %s274_s13 = scalar_lea.sflag [#allocation6], %s273_s17 }
  0x25   : > { %s1314_s26 = smov 64   ;;  %s1315_s24 = smov 4  }
  0x26   : > { %p302_p6 = scmp.lt.s32.totalorder %s1312_s11, 5 }
  0x28   : > { %s282_s10 = scalar_lea.hbm %s1651_s1, %s1019_s22  ;;  %p303_p7 = pnand %p957_p5, %p302_p6 }
  0x29   : > { %s283_s27 = sshll.u32 %s282_s10, 4  ;;  %s308_s9 = sand.u32 (!%p303_p7), 1, %s1288_s28   ;;  %s284_s27 = int_to_ptr.hbm [resolvable:$true] %s283_s27 }
  0x2a   : > { %1037 = dma.hbm_to_vmem [thread:$0]  (!%p1035_p4), %s284_s27, 1024, %s286_s19, %s274_s13, %s1314_s26, %s1314_s26, %s1315_s24  }
  0x2b   : > { %306 = sbr.rel (%p303_p7) target bundleno = 500 (0x1f4), region = 32  ;;  %s958_s15 = sshll.u32 (!%p303_p7), %s308_s9, 6 }
  0x2c   : > { %s309_s22 = scalar_lea.sflag (!%p303_p7), [#allocation6], %s308_s9  ;;  %s1470_s21 = scalar_lea.vmem (!%p303_p7), [#allocation5], %s958_s15 }
  0x30   : > { %1263 = dma.done.wait (%p1437_p8), %s309_s22, 1024  }
  0x31   : > { %1265 = vsyncadd (%p1437_p8), %s309_s22, 4294966272  ;;  %s1633_s10 = sand.u32 1, %s1276_s25   ;;  %s960_s24 = sshll.u32 %s1300_s8, 1 }
  0x32   : > { %s959_s26 = sshll.u32 %s1633_s10, 4  ;;  %p375_p3 = scmp.lt.s32.totalorder %s960_s24, 3 }
  0x33   : > { %s1510_s23 = scalar_lea.vmem [#allocation8], %s959_s26  ;;  %p972_p8 = scmp.ne.s32.totalorder %s1296_s30, 0 }
  0x34   : > { %s1672_s24 = smov (!%p375_p3, %s960_s24), 3 }
  0x35   : > { %s961_s18 = sshll.u32 %s1672_s24, 2  ;;  %s963_s19 = sshll.u32 %s1672_s24, 3 }
  0x36   : > { %s1483_s17 = scalar_lea.vmem %s1619_s0, %s961_s18  ;;  %s1488_s20 = scalar_lea.vmem %s1621_s2, %s963_s19 }
  0x37   : > { %s1493_s22 = scalar_lea.vmem %s1623_s4, %s963_s19  ;;  %s1498_s29 = scalar_lea.vmem %s1624_s5, %s963_s19 }
  0x38   : > { %s1503_s18 = scalar_lea.vmem %s1625_s6, %s963_s19  ;;  %s1508_s12 = scalar_lea.vmem %s1626_s7, %s963_s19 }
  0x39   : > { %415 = sbr.rel (%p972_p8) target bundleno = 69 (0x45), region = 40 }
  0x3e   : > { %vm416_vm0 = vcmask 7168   ;;  %v1316_v0 = vmov 0.0  }
  0x3f   : > { %417 = vst.msk [vmem:[#allocation2] sm:$0xff] %vm416_vm0, %v1316_v0 }
  0x40   : > { %418 = vst.msk [vmem:[#allocation2 + $0x8] sm:$0xff] %vm416_vm0, %v1316_v0 }
  0x41   : > { %419 = vst.msk [vmem:[#allocation3] sm:$0xff] %vm416_vm0, %v1316_v0 }
  0x42   : > { %420 = vst.msk [vmem:[#allocation3 + $0x8] sm:$0xff] %vm416_vm0, %v1316_v0 }
  0x43   : > { %421 = vst.msk [vmem:[#allocation4] sm:$0xff] %vm416_vm0, %v1316_v0 }
  0x44   : > { %422 = vst.msk [vmem:[#allocation4 + $0x8] sm:$0xff] %vm416_vm0, %v1316_v0 }
  0x45 PF: > { %v1028_v1 = vld [vmem:[%s1470_s21 + $0x38] sm:$0xff]  ;;  %v1027_v2 = vld [vmem:[%s1470_s21 + $0x30] sm:$0xff]  ;;  %v1026_v3 = vld [vmem:[%s1470_s21 + $0x28] sm:$0xff]  ;;  %s1009_s1 = sshll.u32 %s1296_s30, 7  ;;  %v1317_v9 = vmov 0   ;;  %v519_v16 = vlaneseq  ;;  %vm559_vm3 = vcmask 7168  }
  0x46   : > { %495 = vmatpush.bf16.xpose.msra.mxu0 %v1028_v1  ;;  %v1025_v4 = vld [vmem:[%s1470_s21 + $0x20] sm:$0xff]  ;;  %v1024_v5 = vld [vmem:[%s1470_s21 + $0x18] sm:$0xff]  ;;  %v513_v6 = vld [vmem:[%s1488_s20] sm:$0xff]  ;;  %v516_v7 = vstv %s1009_s1  ;;  %1139 = vset.pattern.permute.xlu0 %v1317_v9  ;;  %p1010_p9 = scmp.ne.s32.totalorder %s1296_s30, 1 }
  0x47   : > { %v517_v8 = vsub.s32 %v513_v6, %v516_v7  ;;  %v514_v10 = vld [vmem:[%s1488_s20 + $0x8] sm:$0xff]  ;;  %v1023_v11 = vld [vmem:[%s1470_s21 + $0x10] sm:$0xff]  ;;  %v1022_v13 = vld [vmem:[%s1470_s21 + $0x8] sm:$0xff]  ;;  %v520_v17 = vand.u32 127, %v519_v16 }
  0x48   : > { %v518_v12 = vsub.s32 %v514_v10, %v516_v7  ;;  %v1021_v14 = vld [vmem:[%s1470_s21] sm:$0xff]  ;;  %v1020_v15 = vld [vmem:[%s1483_s17] sm:$0xff]  ;;  %v550_v51 = vld [vmem:[#allocation2 + $0x8] sm:$0xff] }
  0x49   : > { %522 = vperm.xlu0 %1139, %v517_v8   ;;  %v549_v44 = vld [vmem:[#allocation2] sm:$0xff]  ;;  %v562_v56 = vld [vmem:[#allocation3] sm:$0xff]  ;;  %v563_v59 = vld [vmem:[#allocation3 + $0x8] sm:$0xff] }
  0x4a   : > { %v574_v42 = vld [vmem:[#allocation4] sm:$0xff] }
  0x4b   : > { %v575_v49 = vld [vmem:[#allocation4 + $0x8] sm:$0xff] }
  0x4e   : > { %496 = vmatpush.bf16.xpose.msra.mxu0 %v1027_v2 }
  0x51   : > { %525 = vperm.xlu0 %1139, %v518_v12  }
  0x56   : > { %497 = vmatpush.bf16.xpose.msra.mxu0 %v1026_v3 }
  0x5e   : > { %498 = vmatpush.bf16.xpose.msra.mxu0 %v1025_v4 }
  0x66   : > { %499 = vmatpush.bf16.xpose.msra.mxu0 %v1024_v5 }
  0x6e   : > { %500 = vmatpush.bf16.xpose.msra.mxu0 %v1023_v11 }
  0x76   : > { %501 = vmatpush.bf16.xpose.msra.mxu0 %v1022_v13 }
  0x7e   : > { %502 = vmatpush.bf16.xpose.msra.mxu0 %v1021_v14 }
  0x85   : > { %503 = vmatmul.bf16.vlgmr.msra.gmra.mxu0 %v1020_v15 }
  0xbb   : > { %v523_v18 = vpop.permute.xlu0 %522 }
  0xbc   : > { %vm527_vm1 = vcmp.eq.s32.totalorder %v520_v17, %v523_v18 }
  0xc3   : > { %v526_v24 = vpop.permute.xlu0 %525 }
  0xc4   : > { %vm528_vm2 = vcmp.eq.s32.totalorder %v520_v17, %v526_v24 }
 0x102   : > { %v504_v19 = vpop.f32.mrf.mxu0 }
 0x103   : > { %v509_v20 = vmul.f32 64.0, %v504_v19  ;;  %551 = vadd.xlane.f32.xlu2 %v504_v19  ;;  %v529_v21 = vsel %vm527_vm1, 0.0, %v504_v19 }
 0x104   : > { %545 = vadd.xlane.f32.xlu1 %v529_v21  ;;  %v531_v22 = vsub.f32 0.33423772, %v529_v21 }
 0x105   : > { %511 = vst [vmem:[%s1510_s23] sm:$0xff] %v509_v20 }
 0x106   : > { %v533_v23 = vmul.f32 84.881645, %v531_v22 }
 0x108   : > { %v535_v25 = vmin.f32 %v533_v23, 80.0 }
 0x10a   : > { %v537_v26 = vmul.f32 1.442695, %v535_v25  ;;  %v506_v27 = vpop.f32.mrf.mxu0 }
 0x10b   : > { %v510_v28 = vmul.f32 64.0, %v506_v27  ;;  %553 = vadd.xlane.f32.xlu2 %v506_v27  ;;  %v530_v29 = vsel %vm528_vm2, 0.0, %v506_v27 }
 0x10c   : > { %1140 = vpow2.f32 %v537_v26  ;;  %547 = vadd.xlane.f32.xlu1 %v530_v29  ;;  %v532_v30 = vsub.f32 0.33423772, %v530_v29 }
 0x10d   : > { %512 = vst [vmem:[%s1510_s23 + $0x8] sm:$0xff] %v510_v28 }
 0x10e   : > { %v534_v31 = vmul.f32 84.881645, %v532_v30 }
 0x110   : > { %v536_v32 = vmin.f32 %v534_v31, 80.0 }
 0x112   : > { %v1141_v33 = vpop.eup %1140  ;;  %v539_v34 = vmul.f32 1.442695, %v536_v32 }
 0x113   : > { %v541_v35 = vadd.f32 1.0, %v1141_v33 }
 0x114   : > { %1142 = vpow2.f32 %v539_v34 }
 0x115   : > { %1144 = vrcp.f32 %v541_v35 }
 0x11a   : > { %v1143_v36 = vpop.eup %1142 }
 0x11b   : > { %v1145_v37 = vpop.eup %1144  ;;  %v542_v38 = vadd.f32 1.0, %v1143_v36 }
 0x11c   : > { %v564_v39 = vmul.f32 %v1145_v37, %v529_v21 }
 0x11d   : > { %1146 = vrcp.f32 %v542_v38 }
 0x11e   : > { %566 = vadd.xlane.f32.xlu0 %v564_v39 }
 0x123   : > { %v1147_v40 = vpop.eup %1146 }
 0x124   : > { %v565_v41 = vmul.f32 %v1147_v40, %v530_v29 }
 0x126   : > { %568 = vadd.xlane.f32.xlu1 %v565_v41 }
 0x176   : > { %v552_v43 = vpop.xlane.xlu2 %551 }
 0x177   : > { %v546_v45 = vpop.xlane.xlu1 %545 }
 0x178   : > { %v555_v46 = vsub.f32 %v552_v43, %v546_v45  ;;  %v576_v47 = vadd.f32 %v574_v42, %v546_v45 }
 0x17a   : > { %v557_v48 = vadd.f32 %v555_v46, %v549_v44  ;;  %578 = vst.msk [vmem:[#allocation4] sm:$0xff] %vm559_vm3, %v576_v47 }
 0x17c   : > { %560 = vst.msk [vmem:[#allocation2] sm:$0xff] %vm559_vm3, %v557_v48 }
 0x17e   : > { %v554_v50 = vpop.xlane.xlu2 %553 }
 0x17f   : > { %v548_v52 = vpop.xlane.xlu1 %547 }
 0x180   : > { %v556_v53 = vsub.f32 %v554_v50, %v548_v52  ;;  %v577_v54 = vadd.f32 %v575_v49, %v548_v52 }
 0x182   : > { %v558_v55 = vadd.f32 %v556_v53, %v550_v51  ;;  %579 = vst.msk [vmem:[#allocation4 + $0x8] sm:$0xff] %vm559_vm3, %v577_v54 }
 0x184   : > { %561 = vst.msk [vmem:[#allocation2 + $0x8] sm:$0xff] %vm559_vm3, %v558_v55 }
 0x191   : > { %v567_v57 = vpop.xlane.xlu0 %566 }
 0x192   : > { %v570_v58 = vadd.f32 %v567_v57, %v562_v56 }
 0x194   : > { %572 = vst.msk [vmem:[#allocation3] sm:$0xff] %vm559_vm3, %v570_v58 }
 0x198   : > { %583 = sbr.rel (%p1010_p9) target bundleno = 481 (0x1e1), region = 44 }
 0x199   : > { %v569_v60 = vpop.xlane.xlu1 %568 }
 0x19a   : > { %v571_v61 = vadd.f32 %v569_v60, %v563_v59 }
 0x19c   : > { %573 = vst.msk [vmem:[#allocation3 + $0x8] sm:$0xff] %vm559_vm3, %v571_v61 }
 0x19d   : > { %v1534_v62 = vld [vmem:[#allocation2] sm:$0xff]  ;;  %v1536_v63 = vld [vmem:[#allocation2 + $0x8] sm:$0xff]  ;;  %v676_v53 = vld [vmem:[#allocation3] sm:$0xff] }
 0x19e   : > { %v1539_v0 = vmul.f32 64.0, %v1534_v62  ;;  %v588_v1 = vand.u32 2147483647, %v1534_v62  ;;  %v589_v2 = vand.u32 2147483647, %v1536_v63  ;;  %v587_v54 = vmul.f32 64.0, %v1536_v63 }
 0x19f   : > { %v678_v56 = vmul.f32 64.0, %v676_v53  ;;  %v682_v60 = vld [vmem:[#allocation4] sm:$0xff]  ;;  %vm648_vm8 = vcmp.ge.f32.partialorder %v1534_v62, 0.0  ;;  %vm649_vm9 = vcmp.ge.f32.partialorder %v1536_v63, 0.0 }
 0x1a0   : > { %v590_v3 = vmin.f32 %v588_v1, 1.0  ;;  %668 = vst.msk [vmem:[%s1493_s22] sm:$0xff] %vm559_vm3, %v1539_v0  ;;  %v591_v4 = vmin.f32 %v589_v2, 1.0  ;;  %v683_v2 = vld [vmem:[#allocation4 + $0x8] sm:$0xff] }
 0x1a1   : > { %669 = vst.msk [vmem:[%s1493_s22 + $0x8] sm:$0xff] %vm559_vm3, %v587_v54 }
 0x1a2   : > { %v620_v5 = vsub.f32 1.0, %v590_v3  ;;  %v592_v6 = vmul.f32 -0.0012624911, %v590_v3  ;;  %v593_v7 = vmul.f32 -0.0012624911, %v591_v4  ;;  %v621_v8 = vsub.f32 1.0, %v591_v4 }
 0x1a3   : > { %v677_v58 = vld [vmem:[#allocation3 + $0x8] sm:$0xff]  ;;  %680 = vst.msk [vmem:[%s1503_s18] sm:$0xff] %vm559_vm3, %v678_v56 }
 0x1a4   : > { %v594_v9 = vadd.f32 0.00667009, %v592_v6  ;;  %1148 = vrsqrt.f32 %v620_v5  ;;  %v595_v10 = vadd.f32 0.00667009, %v593_v7  ;;  %vm629_vm4 = vcmp.eq.f32.partialorder %v620_v5, inf  ;;  %684 = vst.msk [vmem:[%s1508_s12] sm:$0xff] %vm559_vm3, %v682_v60 }
 0x1a5   : > { %1150 = vrsqrt.f32 %v621_v8  ;;  %vm641_vm5 = vcmp.eq.f32.partialorder %v621_v8, inf  ;;  %v632_v42 = vand.u32 2147483648, %v620_v5  ;;  %vm631_vm6 = vcmp.eq.f32.partialorder %v620_v5, 0.0  ;;  %685 = vst.msk [vmem:[%s1508_s12 + $0x8] sm:$0xff] %vm559_vm3, %v683_v2 }
 0x1a6   : > { %v596_v11 = vmul.f32 %v594_v9, %v590_v3  ;;  %v597_v12 = vmul.f32 %v595_v10, %v591_v4  ;;  %v644_v46 = vand.u32 2147483648, %v621_v8  ;;  %vm643_vm7 = vcmp.eq.f32.partialorder %v621_v8, 0.0 }
 0x1a7   : > { %v679_v61 = vmul.f32 64.0, %v677_v58 }
 0x1a8   : > { %v598_v13 = vadd.f32 -0.017088126, %v596_v11  ;;  %v599_v14 = vadd.f32 -0.017088126, %v597_v12 }
 0x1a9   : > { %681 = vst.msk [vmem:[%s1503_s18 + $0x8] sm:$0xff] %vm559_vm3, %v679_v61 }
 0x1aa   : > { %v1149_v15 = vpop.eup %1148  ;;  %v600_v16 = vmul.f32 %v598_v13, %v590_v3  ;;  %v601_v19 = vmul.f32 %v599_v14, %v591_v4 }
 0x1ab   : > { %v1151_v17 = vpop.eup %1150  ;;  %v623_v18 = vmul.f32 %v1149_v15, %v620_v5 }
 0x1ac   : > { %v602_v20 = vadd.f32 0.03089188, %v600_v16  ;;  %v635_v21 = vmul.f32 %v1151_v17, %v621_v8  ;;  %v603_v23 = vadd.f32 0.03089188, %v601_v19 }
 0x1ad   : > { %v624_v22 = vmul.f32 %v1149_v15, %v623_v18 }
 0x1ae   : > { %v604_v24 = vmul.f32 %v602_v20, %v590_v3  ;;  %v636_v25 = vmul.f32 %v1151_v17, %v635_v21  ;;  %v605_v27 = vmul.f32 %v603_v23, %v591_v4 }
 0x1af   : > { %v625_v26 = vmul.f32 0.5, %v624_v22 }
 0x1b0   : > { %v606_v28 = vadd.f32 -0.050174303, %v604_v24  ;;  %v637_v29 = vmul.f32 0.5, %v636_v25  ;;  %v607_v31 = vadd.f32 -0.050174303, %v605_v27 }
 0x1b1   : > { %v626_v30 = vsub.f32 1.5, %v625_v26 }
 0x1b2   : > { %v608_v32 = vmul.f32 %v606_v28, %v590_v3  ;;  %v638_v33 = vsub.f32 1.5, %v637_v29  ;;  %v609_v35 = vmul.f32 %v607_v31, %v591_v4 }
 0x1b3   : > { %v627_v34 = vmul.f32 %v1149_v15, %v626_v30 }
 0x1b4   : > { %v610_v36 = vadd.f32 0.08897899, %v608_v32  ;;  %v639_v37 = vmul.f32 %v1151_v17, %v638_v33  ;;  %v611_v39 = vadd.f32 0.08897899, %v609_v35 }
 0x1b5   : > { %v628_v38 = vmul.f32 %v627_v34, %v620_v5 }
 0x1b6   : > { %v612_v40 = vmul.f32 %v610_v36, %v590_v3  ;;  %v640_v41 = vmul.f32 %v639_v37, %v621_v8  ;;  %v613_v43 = vmul.f32 %v611_v39, %v591_v4 }
 0x1b7   : > { %v630_v45 = vsel %vm629_vm4, %v620_v5, %v628_v38 }
 0x1b8   : > { %v614_v44 = vadd.f32 -0.2145988, %v612_v40  ;;  %v615_v47 = vadd.f32 -0.2145988, %v613_v43  ;;  %v642_v48 = vsel %vm641_vm5, %v621_v8, %v640_v41  ;;  %v633_v50 = vsel %vm631_vm6, %v632_v42, %v630_v45 }
 0x1b9   : > { %v645_v55 = vsel %vm643_vm7, %v644_v46, %v642_v48 }
 0x1ba   : > { %v616_v49 = vmul.f32 %v614_v44, %v590_v3  ;;  %v617_v51 = vmul.f32 %v615_v47, %v591_v4 }
 0x1bc   : > { %v618_v52 = vadd.f32 1.5707963, %v616_v49  ;;  %v619_v57 = vadd.f32 1.5707963, %v617_v51 }
 0x1be   : > { %v646_v59 = vmul.f32 %v633_v50, %v618_v52  ;;  %v647_v1 = vmul.f32 %v645_v55, %v619_v57 }
 0x1c0   : > { %v650_v3 = vsub.f32 3.1415927, %v646_v59  ;;  %v651_v4 = vsub.f32 3.1415927, %v647_v1 }
 0x1c2   : > { %v652_v5 = vsel %vm648_vm8, %v646_v59, %v650_v3  ;;  %v653_v7 = vsel %vm649_vm9, %v647_v1, %v651_v4 }
 0x1c3   : > { %v1011_v6 = vadd.f32 -0.8, %v652_v5  ;;  %v1012_v8 = vadd.f32 -0.8, %v653_v7 }
 0x1c5   : > { %v656_v9 = vmul.f32 -80.0, %v1011_v6  ;;  %v657_v62 = vmul.f32 -80.0, %v1012_v8 }
 0x1c7   : > { %v658_v10 = vmin.f32 %v656_v9, 80.0  ;;  %v659_v11 = vmin.f32 %v657_v62, 80.0 }
 0x1c9   : > { %v660_v12 = vmul.f32 1.442695, %v658_v10  ;;  %v662_v13 = vmul.f32 1.442695, %v659_v11 }
 0x1cb   : > { %1152 = vpow2.f32 %v660_v12 }
 0x1cc   : > { %1154 = vpow2.f32 %v662_v13 }
 0x1d1   : > { %v1153_v63 = vpop.eup %1152 }
 0x1d2   : > { %v1155_v14 = vpop.eup %1154  ;;  %v664_v15 = vadd.f32 1.0, %v1153_v63 }
 0x1d3   : > { %v665_v16 = vadd.f32 1.0, %v1155_v14 }
 0x1d4   : > { %1156 = vrcp.f32 %v664_v15 }
 0x1d5   : > { %1158 = vrcp.f32 %v665_v16 }
 0x1da   : > { %v1157_v17 = vpop.eup %1156 }
 0x1db   : > { %v1159_v18 = vpop.eup %1158  ;;  %v670_v19 = vsub.f32 0.0, %v1157_v17 }
 0x1dc   : > { %v671_v20 = vsub.f32 0.0, %v1159_v18 }
 0x1dd   : > { %v672_v21 = vmul.f32 %v670_v19, %v1539_v0 }
 0x1de   : > { %v673_v22 = vmul.f32 %v671_v20, %v587_v54 }
 0x1df   : > { %674 = vst.msk [vmem:[%s1498_s29] sm:$0xff] %vm559_vm3, %v672_v21 }
 0x1e0   : > { %675 = vst.msk [vmem:[%s1498_s29 + $0x8] sm:$0xff] %vm559_vm3, %v673_v22 }
 0x1e1 PF: > { %s1029_s28 = sshll.u32 %s1300_s8, 2  ;;  %s721_s10 = sshll.u32 %s1510_s23, 4  ;;  %s722_s10 = int_to_ptr.vmem [resolvable:$true] %s721_s10 }
 0x1e2   : > { %s718_s21 = sadd.s32 %s1296_s30, %s1029_s28  ;;  %s1652_s15 = sand.u32 1, %s1276_s25  }
 0x1e3   : > { %s1016_s26 = sshll.u32 %s718_s21, 3  ;;  %s687_s22 = scalar_lea.sflag [#allocation7], %s1652_s15 }
 0x1e4   : > { %s720_s20 = scalar_lea.hbm %s1622_s3, %s1016_s26  ;;  %s1210_s18 = scalar_lea.hbm %s1622_s3, 64 }
 0x1e5   : > { %s723_s13 = sshll.u32 %s720_s20, 4  ;;  %s724_s13 = int_to_ptr.hbm [resolvable:$true] %s723_s13 }
 0x1e6   : > { %s1204_s29 = sshra.s32 %s724_s13, 4  ;;  %s1205_s29 = int_to_ptr.hbm [resolvable:$true] %s1204_s29 }
 0x1e7   : > { %s1206_s24 = scalar_lea.hbm %s1205_s29, 16  ;;  %p1211_p0 = scmp.lt.s32.totalorder %s1205_s29, %s1622_s3 }
 0x1e8   : > { %p1207_p10 = scmp.ne.s32.totalorder %s1205_s29, %s1206_s24  ;;  %p1212_p1 = scmp.lt.s32.totalorder %s1210_s18, %s1206_s24 }
 0x1ea   : > { %p1208_p11 = pnand %p1207_p10, %p1451_p13  ;;  %p1213_p4 = por %p1212_p1, %p1211_p0 }
 0x1ec   : > { %p1209_p12 = pneg %p1208_p11 }
 0x1ee   : > { %p1214_p5 = pnand %p1213_p4, %p1209_p12 }
 0x1f0   : > { %1217 = shalt.err (!%p1214_p5)
}
 0x1f1   : > { %s1318_s12 = smov 128   ;;  %s1319_s23 = smov 256  }
 0x1f2   : > { %s1320_s1 = smov 8  }
 0x1f3   : > { %1032 = dma.vmem_to_hbm [thread:$0]  (%p1451_p13), %s722_s10, 256, %s724_s13, %s687_s22, %s1318_s12, %s1319_s23, %s1320_s1  }
 0x1f4 PF: > { %s1653_s28 = sld [smem:[#allocation11_spill]]  ;;  %p1043_p6 = scmp.ge.s32.totalorder %s1312_s11, 2 }
 0x1f6   : > { %p1039_p7 = pnand %p1043_p6, %p1456_p2 }
 0x1f8   : > { %p1040_p3 = pneg %p1039_p7 }
 0x1fa   : > { %s754_s21 = sand.u32 1, %s1653_s28  }
 0x1fb   : > { %s755_s26 = scalar_lea.sflag [#allocation7], %s754_s21 }
 0x1fc   : > { %1267 = dma.done.wait (%p1040_p3), %s755_s26, 256  }
 0x1fd   : > { %1269 = vsyncadd (%p1040_p3), %s755_s26, 4294967040  ;;  %s24_s11 = sadd.s32 1, %s1312_s11   ;;  %s1654_s19 = sld [smem:[#allocation12_spill]] }
 0x1fe   : > { %p21_p8 = scmp.ge.s32.totalorder %s24_s11, 6   ;;  %s1655_s26 = sld [smem:[#allocation20_spill]] }
 0x1ff   : > { %s1656_s27 = sld [smem:[#allocation13_spill]]  ;;  %s1663_s24 = smov %s1276_s25 }
 0x200   : > { %s1657_s28 = sld [smem:[#allocation14_spill]] }
 0x201   : > { %s1658_s29 = sld [smem:[#allocation19_spill]]  ;;  %23 = sbr.rel (!%p21_p8) target bundleno = 11 (0xb), region = 139 }
 0x202   : > { %s1659_s30 = sld [smem:[#allocation15_spill]] }
 0x203   : > { %s1660_s8 = sld [smem:[#allocation16_spill]]  ;;  %s1664_s25 = smov %s1654_s19 }
 0x204   : > { %s1661_s9 = sld [smem:[#allocation17_spill]] }
 0x205   : > { %s1662_s10 = sld [smem:[#allocation18_spill]] }
 0x206   :  { %793 = vsyncpa [#allocation6], 1 }
 0x207   :  { %795 = vsyncpa [#allocation6 + $0x1], 1 }
 0x208   :  { %796 = vsyncpa [#allocation7], 1 }
 0x209   :  { %798 = vsyncpa [#allocation7 + $0x1], 1 }

</bundles_post_ra>
